<compile_context>
chip_gen: v5e
topology: v5e:2x2
jax: 0.10.0
libtpu: 0.0.40
codegen_flags: <defaults>
</compile_context>

<pallas_src>
import jax
import jax.numpy as jnp
from jax.experimental import pallas as pl
from jax.experimental.pallas import tpu as pltpu


# ----------------------------------------------------------------------------
# In-kernel math
# ----------------------------------------------------------------------------
def _recip(x):
    """EUP approx reciprocal + one Newton step (~f32 accuracy, no full divide)."""
    y = pl.reciprocal(x, approx=True)
    return y * (2.0 - x * y)


def _hue_math(r, g, b, shift):
    """Per-pixel hue shift on dense f32 (TR, TC) slabs.

    `shift` is a scalar fraction of a full turn, |shift| <= 1 (kornia hue<=0.5).
    """
    maxc = jnp.maximum(jnp.maximum(r, g), b)
    minc = jnp.minimum(jnp.minimum(r, g), b)
    v = maxc
    delta = maxc - minc
    gray = delta == 0.0

    inv_delta = _recip(jnp.where(gray, 1.0, delta))
    inv_maxc = _recip(jnp.where(maxc == 0.0, 1.0, maxc))
    s = jnp.where(maxc == 0.0, 0.0, delta * inv_maxc)

    # Hue in "sector" units h6 in [0, 6).
    hr = (g - b) * inv_delta
    hr = jnp.where(hr < 0.0, hr + 6.0, hr)
    hg = (b - r) * inv_delta + 2.0
    hb = (r - g) * inv_delta + 4.0
    h6 = jnp.where(maxc == r, hr, jnp.where(maxc == g, hg, hb))
    h6 = jnp.where(gray, 0.0, h6)

    # Shift (scalar) and wrap back into [0, 6) — |shift*6| <= 6 so one wrap each way.
    h6 = h6 + shift * 6.0
    h6 = jnp.where(h6 < 0.0, h6 + 6.0, h6)
    h6 = jnp.where(h6 >= 6.0, h6 - 6.0, h6)

    # HSV -> RGB via the arithmetic k-formula: c_n = v - v*s*clamp(min(k, 4-k), 0, 1),
    # k = (n + h6) mod 6, n in {5, 3, 1}  ->  (r, g, b).
    vs = v * s

    def chan(n):
        k = h6 + n
        k = jnp.where(k >= 6.0, k - 6.0, k)
        w = jnp.minimum(jnp.minimum(k, 4.0 - k), 1.0)
        w = jnp.maximum(w, 0.0)
        return v - vs * w

    return chan(5.0), chan(3.0), chan(1.0)


def _hue_kernel(shift_ref, x_ref, o_ref):
    # shift_ref: SMEM (N,) f32 ; x_ref / o_ref: VMEM (1, 3, TR, TC) tiles.
    bidx = pl.program_id(0)
    shift = shift_ref[bidx]

    r = x_ref[0, 0, :, :].astype(jnp.float32)
    g = x_ref[0, 1, :, :].astype(jnp.float32)
    b = x_ref[0, 2, :, :].astype(jnp.float32)

    r_o, g_o, b_o = _hue_math(r, g, b, shift)

    dt = o_ref.dtype
    # TODO(synk): for integer image dtypes (e.g. uint8) round before the cast.
    o_ref[0, 0, :, :] = r_o.astype(dt)
    o_ref[0, 1, :, :] = g_o.astype(dt)
    o_ref[0, 2, :, :] = b_o.astype(dt)


# ----------------------------------------------------------------------------
# Wrapper: tiling + pallas_call
# ----------------------------------------------------------------------------
def _choose_tiles(n: int, length: int):
    """Pick (TC, TR, R_pad): lane tile (mult of 128), sublane tile (mult of 8),
    padded row count.  One f32 (1,3,TR,TC) block targets ~1.5 MiB so 2x input +
    2x output double-buffers stay well inside the 32 MiB scoped VMEM default."""
    TC = min(512, max(128, pl.cdiv(length, 128) * 128))
    R = pl.cdiv(length, TC)
    target_rows = max(8, (1_572_864 // (3 * TC * 4)) // 8 * 8)
    TR = min(target_rows, pl.cdiv(R, 8) * 8)
    R_pad = pl.cdiv(R, TR) * TR
    # v7x has 2 TensorCores sharing the grid — make sure there are >= 2 steps.
    if n * (R_pad // TR) < 2 and TR >= 16:
        TR = max(8, (TR // 2 // 8) * 8)
        R_pad = pl.cdiv(R, TR) * TR
    return TC, TR, R_pad


def hue_forward(x: jax.Array, shifts: jax.Array) -> jax.Array:
    """Apply a per-image hue shift (fraction of a turn) to an NCHW RGB tensor."""
    N, C, H, W = x.shape
    assert C == 3, "Hue/ColorJitter expects RGB images (C == 3)."
    L = H * W
    TC, TR, R_pad = _choose_tiles(N, L)
    L_pad = R_pad * TC

    x2 = x.reshape(N, C, L)
    if L_pad != L:
        x2 = jnp.pad(x2, ((0, 0), (0, 0), (0, L_pad - L)))
    x4 = x2.reshape(N, C, R_pad, TC)

    out4 = pl.pallas_call(
        _hue_kernel,
        out_shape=jax.ShapeDtypeStruct((N, C, R_pad, TC), x.dtype),
        grid=(N, R_pad // TR),
        in_specs=[
            pl.BlockSpec(memory_space=pltpu.MemorySpace.SMEM),        # per-image hue shifts
            pl.BlockSpec((1, C, TR, TC), lambda b, j: (b, 0, j, 0)),  # dense image tile
        ],
        out_specs=pl.BlockSpec((1, C, TR, TC), lambda b, j: (b, 0, j, 0)),
        compiler_params=pltpu.CompilerParams(
            dimension_semantics=("parallel", "parallel"),
            vmem_limit_bytes=32 * 1024 * 1024,
        ),
    )(shifts.astype(jnp.float32), x4)

    out2 = out4.reshape(N, C, L_pad)
    if L_pad != L:
        out2 = out2[:, :, :L]
    return out2.reshape(N, C, H, W)


def hue(image: jax.Array, key: jax.Array, hue_bound: float = 0.1) -> jax.Array:
    """Equivalent of Hue.forward: ColorJitter(hue=hue_bound, p=1) on NCHW images."""
    n = image.shape[0]
    shifts = jax.random.uniform(key, (n,), dtype=jnp.float32,
                                minval=-hue_bound, maxval=hue_bound)
    return hue_forward(image, shifts)


# ----------------------------------------------------------------------------
# Independent pure-JAX reference (exact divides, floor/select HSV->RGB)
# ----------------------------------------------------------------------------
def _hue_reference(x, shifts):
    xf = x.astype(jnp.float32)
    r, g, b = xf[:, 0], xf[:, 1], xf[:, 2]
    maxc = jnp.maximum(jnp.maximum(r, g), b)
    minc = jnp.minimum(jnp.minimum(r, g), b)
    v = maxc
    delta = maxc - minc
    safe = jnp.where(delta == 0.0, 1.0, delta)
    s = jnp.where(maxc == 0.0, 0.0, delta / jnp.where(maxc == 0.0, 1.0, maxc))
    hr = (g - b) / safe
    hr = jnp.where(hr < 0.0, hr + 6.0, hr)
    hg = (b - r) / safe + 2.0
    hb = (r - g) / safe + 4.0
    h = jnp.where(maxc == r, hr, jnp.where(maxc == g, hg, hb))
    h = jnp.where(delta == 0.0, 0.0, h) / 6.0
    h = (h + shifts[:, None, None]) % 1.0
    h6 = h * 6.0
    i = jnp.clip(jnp.floor(h6), 0.0, 5.0)
    f = h6 - i
    p = v * (1.0 - s)
    q = v * (1.0 - s * f)
    t = v * (1.0 - s * (1.0 - f))
    ii = i.astype(jnp.int32)
    sel = [ii == 0, ii == 1, ii == 2, ii == 3, ii == 4]
    r_o = jnp.select(sel, [v, q, p, p, t], v)
    g_o = jnp.select(sel, [t, v, v, q, p], p)
    b_o = jnp.select(sel, [p, p, t, v, v], q)
    return jnp.stack([r_o, g_o, b_o], axis=1).astype(x.dtype)


if __name__ == "__main__":
    k_img, k_hue = jax.random.split(jax.random.PRNGKey(0))
    x = jax.random.uniform(k_img, (2, 3, 16, 16), dtype=jnp.float32)

    # Per-image hue factors, same distribution as the module's forward.
    shifts = jax.random.uniform(k_hue, (2,), dtype=jnp.float32,
                                minval=-0.1, maxval=0.1)

    out = jax.block_until_ready(hue_forward(x, shifts))

    # Exercise the module-equivalent entry point (random factors inside).
    _ = jax.block_until_ready(hue(x, k_hue, hue_bound=0.1))

    # Validate against an independent math path (exact divides, select-based HSV->RGB).
    ref = _hue_reference(x, shifts)

    assert out.shape == x.shape and out.dtype == x.dtype
    err = float(jnp.max(jnp.abs(out - ref)))
    assert err < 1e-5, f"max abs error {err}"
    print("KERNEL_OK")
</pallas_src>

<mosaic_0001>
module attributes {stable_mosaic.version = 11 : i64} {
  func.func @_hue_kernel(%arg0: i32, %arg1: i32, %arg2: memref<2xf32, #tpu.memory_space<smem>>, %arg3: memref<1x3x8x256xf32, #tpu.memory_space<vmem>>, %arg4: memref<1x3x8x256xf32, #tpu.memory_space<vmem>>) attributes {dimension_semantics = [#tpu.dimension_semantics<parallel>, #tpu.dimension_semantics<parallel>], iteration_bounds = array<i64: 2, 1>, scalar_prefetch = 0 : i64, scratch_operands = 0 : i64, tpu.core_type = #tpu.core_type<tc>, window_params = [{transform_indices = @transform_0, window_bounds = array<i64: 2>}, {transform_indices = @transform_1, window_bounds = array<i64: 1, 3, 8, 256>}, {transform_indices = @transform_2, window_bounds = array<i64: 1, 3, 8, 256>}]} {
    %0 = arith.index_cast %arg0 : i32 to index
    %1 = memref.load %arg2[%0] : memref<2xf32, #tpu.memory_space<smem>>
    %c0 = arith.constant 0 : index
    %c0_0 = arith.constant 0 : index
    %c0_1 = arith.constant 0 : index
    %c0_2 = arith.constant 0 : index
    %2 = vector.load %arg3[%c0, %c0_0, %c0_1, %c0_2] : memref<1x3x8x256xf32, #tpu.memory_space<vmem>>, vector<1x1x8x256xf32>
    %3 = vector.shape_cast %2 : vector<1x1x8x256xf32> to vector<8x256xf32>
    %c0_3 = arith.constant 0 : index
    %c1 = arith.constant 1 : index
    %c0_4 = arith.constant 0 : index
    %c0_5 = arith.constant 0 : index
    %4 = vector.load %arg3[%c0_3, %c1, %c0_4, %c0_5] : memref<1x3x8x256xf32, #tpu.memory_space<vmem>>, vector<1x1x8x256xf32>
    %5 = vector.shape_cast %4 : vector<1x1x8x256xf32> to vector<8x256xf32>
    %c0_6 = arith.constant 0 : index
    %c2 = arith.constant 2 : index
    %c0_7 = arith.constant 0 : index
    %c0_8 = arith.constant 0 : index
    %6 = vector.load %arg3[%c0_6, %c2, %c0_7, %c0_8] : memref<1x3x8x256xf32, #tpu.memory_space<vmem>>, vector<1x1x8x256xf32>
    %7 = vector.shape_cast %6 : vector<1x1x8x256xf32> to vector<8x256xf32>
    %8 = arith.maximumf %3, %5 : vector<8x256xf32>
    %9 = arith.maximumf %8, %7 : vector<8x256xf32>
    %10 = arith.minimumf %3, %5 : vector<8x256xf32>
    %11 = arith.minimumf %10, %7 : vector<8x256xf32>
    %12 = arith.subf %9, %11 : vector<8x256xf32>
    %cst = arith.constant 0.000000e+00 : f32
    %13 = vector.broadcast %cst : f32 to vector<8x256xf32>
    %14 = arith.cmpf oeq, %12, %13 : vector<8x256xf32>
    %cst_9 = arith.constant 1.000000e+00 : f32
    %15 = vector.broadcast %cst_9 : f32 to vector<8x256xf32>
    %16 = arith.select %14, %15, %12 : vector<8x256xi1>, vector<8x256xf32>
    %17 = tpu.reciprocal %16 {approx = true} : vector<8x256xf32> -> vector<8x256xf32>
    %18 = arith.mulf %16, %17 : vector<8x256xf32>
    %cst_10 = arith.constant 2.000000e+00 : f32
    %19 = vector.broadcast %cst_10 : f32 to vector<8x256xf32>
    %20 = arith.subf %19, %18 : vector<8x256xf32>
    %21 = arith.mulf %17, %20 : vector<8x256xf32>
    %cst_11 = arith.constant 0.000000e+00 : f32
    %22 = vector.broadcast %cst_11 : f32 to vector<8x256xf32>
    %23 = arith.cmpf oeq, %9, %22 : vector<8x256xf32>
    %cst_12 = arith.constant 1.000000e+00 : f32
    %24 = vector.broadcast %cst_12 : f32 to vector<8x256xf32>
    %25 = arith.select %23, %24, %9 : vector<8x256xi1>, vector<8x256xf32>
    %26 = tpu.reciprocal %25 {approx = true} : vector<8x256xf32> -> vector<8x256xf32>
    %27 = arith.mulf %25, %26 : vector<8x256xf32>
    %cst_13 = arith.constant 2.000000e+00 : f32
    %28 = vector.broadcast %cst_13 : f32 to vector<8x256xf32>
    %29 = arith.subf %28, %27 : vector<8x256xf32>
    %30 = arith.mulf %26, %29 : vector<8x256xf32>
    %cst_14 = arith.constant 0.000000e+00 : f32
    %31 = vector.broadcast %cst_14 : f32 to vector<8x256xf32>
    %32 = arith.cmpf oeq, %9, %31 : vector<8x256xf32>
    %33 = arith.mulf %12, %30 : vector<8x256xf32>
    %cst_15 = arith.constant 0.000000e+00 : f32
    %34 = vector.broadcast %cst_15 : f32 to vector<8x256xf32>
    %35 = arith.select %32, %34, %33 : vector<8x256xi1>, vector<8x256xf32>
    %36 = arith.subf %5, %7 : vector<8x256xf32>
    %37 = arith.mulf %36, %21 : vector<8x256xf32>
    %cst_16 = arith.constant 0.000000e+00 : f32
    %38 = vector.broadcast %cst_16 : f32 to vector<8x256xf32>
    %39 = arith.cmpf olt, %37, %38 : vector<8x256xf32>
    %cst_17 = arith.constant 6.000000e+00 : f32
    %40 = vector.broadcast %cst_17 : f32 to vector<8x256xf32>
    %41 = arith.addf %37, %40 : vector<8x256xf32>
    %42 = arith.select %39, %41, %37 : vector<8x256xi1>, vector<8x256xf32>
    %43 = arith.subf %7, %3 : vector<8x256xf32>
    %44 = arith.mulf %43, %21 : vector<8x256xf32>
    %cst_18 = arith.constant 2.000000e+00 : f32
    %45 = vector.broadcast %cst_18 : f32 to vector<8x256xf32>
    %46 = arith.addf %44, %45 : vector<8x256xf32>
    %47 = arith.subf %3, %5 : vector<8x256xf32>
    %48 = arith.mulf %47, %21 : vector<8x256xf32>
    %cst_19 = arith.constant 4.000000e+00 : f32
    %49 = vector.broadcast %cst_19 : f32 to vector<8x256xf32>
    %50 = arith.addf %48, %49 : vector<8x256xf32>
    %51 = arith.cmpf oeq, %9, %3 : vector<8x256xf32>
    %52 = arith.cmpf oeq, %9, %5 : vector<8x256xf32>
    %53 = arith.select %52, %46, %50 : vector<8x256xi1>, vector<8x256xf32>
    %54 = arith.select %51, %42, %53 : vector<8x256xi1>, vector<8x256xf32>
    %cst_20 = arith.constant 0.000000e+00 : f32
    %55 = vector.broadcast %cst_20 : f32 to vector<8x256xf32>
    %56 = arith.select %14, %55, %54 : vector<8x256xi1>, vector<8x256xf32>
    %cst_21 = arith.constant 6.000000e+00 : f32
    %57 = arith.mulf %1, %cst_21 : f32
    %58 = vector.broadcast %57 : f32 to vector<8x256xf32>
    %59 = arith.addf %56, %58 : vector<8x256xf32>
    %cst_22 = arith.constant 0.000000e+00 : f32
    %60 = vector.broadcast %cst_22 : f32 to vector<8x256xf32>
    %61 = arith.cmpf olt, %59, %60 : vector<8x256xf32>
    %cst_23 = arith.constant 6.000000e+00 : f32
    %62 = vector.broadcast %cst_23 : f32 to vector<8x256xf32>
    %63 = arith.addf %59, %62 : vector<8x256xf32>
    %64 = arith.select %61, %63, %59 : vector<8x256xi1>, vector<8x256xf32>
    %cst_24 = arith.constant 6.000000e+00 : f32
    %65 = vector.broadcast %cst_24 : f32 to vector<8x256xf32>
    %66 = arith.cmpf oge, %64, %65 : vector<8x256xf32>
    %cst_25 = arith.constant 6.000000e+00 : f32
    %67 = vector.broadcast %cst_25 : f32 to vector<8x256xf32>
    %68 = arith.subf %64, %67 : vector<8x256xf32>
    %69 = arith.select %66, %68, %64 : vector<8x256xi1>, vector<8x256xf32>
    %70 = arith.mulf %9, %35 : vector<8x256xf32>
    %cst_26 = arith.constant 5.000000e+00 : f32
    %71 = vector.broadcast %cst_26 : f32 to vector<8x256xf32>
    %72 = arith.addf %69, %71 : vector<8x256xf32>
    %cst_27 = arith.constant 6.000000e+00 : f32
    %73 = vector.broadcast %cst_27 : f32 to vector<8x256xf32>
    %74 = arith.cmpf oge, %72, %73 : vector<8x256xf32>
    %cst_28 = arith.constant 6.000000e+00 : f32
    %75 = vector.broadcast %cst_28 : f32 to vector<8x256xf32>
    %76 = arith.subf %72, %75 : vector<8x256xf32>
    %77 = arith.select %74, %76, %72 : vector<8x256xi1>, vector<8x256xf32>
    %cst_29 = arith.constant 4.000000e+00 : f32
    %78 = vector.broadcast %cst_29 : f32 to vector<8x256xf32>
    %79 = arith.subf %78, %77 : vector<8x256xf32>
    %80 = arith.minimumf %77, %79 : vector<8x256xf32>
    %cst_30 = arith.constant 1.000000e+00 : f32
    %81 = vector.broadcast %cst_30 : f32 to vector<8x256xf32>
    %82 = arith.minimumf %80, %81 : vector<8x256xf32>
    %cst_31 = arith.constant 0.000000e+00 : f32
    %83 = vector.broadcast %cst_31 : f32 to vector<8x256xf32>
    %84 = arith.maximumf %82, %83 : vector<8x256xf32>
    %85 = arith.mulf %70, %84 : vector<8x256xf32>
    %86 = arith.subf %9, %85 : vector<8x256xf32>
    %cst_32 = arith.constant 3.000000e+00 : f32
    %87 = vector.broadcast %cst_32 : f32 to vector<8x256xf32>
    %88 = arith.addf %69, %87 : vector<8x256xf32>
    %cst_33 = arith.constant 6.000000e+00 : f32
    %89 = vector.broadcast %cst_33 : f32 to vector<8x256xf32>
    %90 = arith.cmpf oge, %88, %89 : vector<8x256xf32>
    %cst_34 = arith.constant 6.000000e+00 : f32
    %91 = vector.broadcast %cst_34 : f32 to vector<8x256xf32>
    %92 = arith.subf %88, %91 : vector<8x256xf32>
    %93 = arith.select %90, %92, %88 : vector<8x256xi1>, vector<8x256xf32>
    %cst_35 = arith.constant 4.000000e+00 : f32
    %94 = vector.broadcast %cst_35 : f32 to vector<8x256xf32>
    %95 = arith.subf %94, %93 : vector<8x256xf32>
    %96 = arith.minimumf %93, %95 : vector<8x256xf32>
    %cst_36 = arith.constant 1.000000e+00 : f32
    %97 = vector.broadcast %cst_36 : f32 to vector<8x256xf32>
    %98 = arith.minimumf %96, %97 : vector<8x256xf32>
    %cst_37 = arith.constant 0.000000e+00 : f32
    %99 = vector.broadcast %cst_37 : f32 to vector<8x256xf32>
    %100 = arith.maximumf %98, %99 : vector<8x256xf32>
    %101 = arith.mulf %70, %100 : vector<8x256xf32>
    %102 = arith.subf %9, %101 : vector<8x256xf32>
    %cst_38 = arith.constant 1.000000e+00 : f32
    %103 = vector.broadcast %cst_38 : f32 to vector<8x256xf32>
    %104 = arith.addf %69, %103 : vector<8x256xf32>
    %cst_39 = arith.constant 6.000000e+00 : f32
    %105 = vector.broadcast %cst_39 : f32 to vector<8x256xf32>
    %106 = arith.cmpf oge, %104, %105 : vector<8x256xf32>
    %cst_40 = arith.constant 6.000000e+00 : f32
    %107 = vector.broadcast %cst_40 : f32 to vector<8x256xf32>
    %108 = arith.subf %104, %107 : vector<8x256xf32>
    %109 = arith.select %106, %108, %104 : vector<8x256xi1>, vector<8x256xf32>
    %cst_41 = arith.constant 4.000000e+00 : f32
    %110 = vector.broadcast %cst_41 : f32 to vector<8x256xf32>
    %111 = arith.subf %110, %109 : vector<8x256xf32>
    %112 = arith.minimumf %109, %111 : vector<8x256xf32>
    %cst_42 = arith.constant 1.000000e+00 : f32
    %113 = vector.broadcast %cst_42 : f32 to vector<8x256xf32>
    %114 = arith.minimumf %112, %113 : vector<8x256xf32>
    %cst_43 = arith.constant 0.000000e+00 : f32
    %115 = vector.broadcast %cst_43 : f32 to vector<8x256xf32>
    %116 = arith.maximumf %114, %115 : vector<8x256xf32>
    %117 = arith.mulf %70, %116 : vector<8x256xf32>
    %118 = arith.subf %9, %117 : vector<8x256xf32>
    %c0_44 = arith.constant 0 : index
    %c0_45 = arith.constant 0 : index
    %c0_46 = arith.constant 0 : index
    %c0_47 = arith.constant 0 : index
    %119 = vector.load %arg4[%c0_44, %c0_45, %c0_46, %c0_47] : memref<1x3x8x256xf32, #tpu.memory_space<vmem>>, vector<1x1x8x256xf32>
    %120 = vector.shape_cast %119 : vector<1x1x8x256xf32> to vector<8x256xf32>
    %121 = vector.shape_cast %86 : vector<8x256xf32> to vector<1x1x8x256xf32>
    tpu.vector_store %arg4[%c0_44, %c0_45, %c0_46, %c0_47], %121 {strides = array<i32>} : memref<1x3x8x256xf32, #tpu.memory_space<vmem>>, vector<1x1x8x256xf32>,
    %c0_48 = arith.constant 0 : index
    %c1_49 = arith.constant 1 : index
    %c0_50 = arith.constant 0 : index
    %c0_51 = arith.constant 0 : index
    %122 = vector.load %arg4[%c0_48, %c1_49, %c0_50, %c0_51] : memref<1x3x8x256xf32, #tpu.memory_space<vmem>>, vector<1x1x8x256xf32>
    %123 = vector.shape_cast %122 : vector<1x1x8x256xf32> to vector<8x256xf32>
    %124 = vector.shape_cast %102 : vector<8x256xf32> to vector<1x1x8x256xf32>
    tpu.vector_store %arg4[%c0_48, %c1_49, %c0_50, %c0_51], %124 {strides = array<i32>} : memref<1x3x8x256xf32, #tpu.memory_space<vmem>>, vector<1x1x8x256xf32>,
    %c0_52 = arith.constant 0 : index
    %c2_53 = arith.constant 2 : index
    %c0_54 = arith.constant 0 : index
    %c0_55 = arith.constant 0 : index
    %125 = vector.load %arg4[%c0_52, %c2_53, %c0_54, %c0_55] : memref<1x3x8x256xf32, #tpu.memory_space<vmem>>, vector<1x1x8x256xf32>
    %126 = vector.shape_cast %125 : vector<1x1x8x256xf32> to vector<8x256xf32>
    %127 = vector.shape_cast %118 : vector<8x256xf32> to vector<1x1x8x256xf32>
    tpu.vector_store %arg4[%c0_52, %c2_53, %c0_54, %c0_55], %127 {strides = array<i32>} : memref<1x3x8x256xf32, #tpu.memory_space<vmem>>, vector<1x1x8x256xf32>,
    return
  }
  func.func @transform_0(%arg0: i32, %arg1: i32) -> i32 {
    %c0_i32 = arith.constant 0 : i32
    %c0_i32_0 = arith.constant 0 : i32
    return %c0_i32 : i32
  }
  func.func @transform_1(%arg0: i32, %arg1: i32) -> (i32, i32, i32, i32) {
    %c0_i32 = arith.constant 0 : i32
    %c0_i32_0 = arith.constant 0 : i32
    %c0_i32_1 = arith.constant 0 : i32
    return %arg0, %c0_i32, %arg1, %c0_i32_0 : i32, i32, i32, i32
  }
  func.func @transform_2(%arg0: i32, %arg1: i32) -> (i32, i32, i32, i32) {
    %c0_i32 = arith.constant 0 : i32
    %c0_i32_0 = arith.constant 0 : i32
    %c0_i32_1 = arith.constant 0 : i32
    return %arg0, %c0_i32, %arg1, %c0_i32_0 : i32, i32, i32, i32
  }
}

</mosaic_0001>

<bundles_post_ra>
// kernel: tpu_custom_call.1
= control target key start
LH: loop header
LB: loop body
LE: loop exit
PB: predicated region body
PF: predicated region fallthrough
CT: control target
= control target key end

     0   :  { %7 = vsyncpa [#allocation5], 0  ;;  %s985_s0 = inlined_call_operand.hbm [shape: f32[2], index: 0, kind: input, shape index: {}]   ;;  %s986_s1 = inlined_call_operand.hbm [shape: f32[2,3,8,256], index: 1, kind: input, shape index: {}]   ;;  %s987_s2 = inlined_call_operand.hbm [shape: f32[2,3,8,256], index: 2, kind: output, shape index: {}]  }
   0x1   :  { %8 = vsyncpa [#allocation3], 0 }
   0x2   :  { %10 = vsyncpa [#allocation3 + $0x1], 0 }
   0x3   :  { %11 = vsyncpa [#allocation4], 0 }
   0x4   :  { %13 = vsyncpa [#allocation4 + $0x1], 0  ;;  %s747_s9 = smov 0   ;;  %s749_s10 = smov 0  }
   0x5   :  { %s751_s11 = smov 0   ;;  %s753_s12 = smov 0  }
   0x6   :  { %s755_s13 = smov 0   ;;  %s757_s14 = smov 0  }
   0x7 LB: > { %s478_s15 = sadd.s32 4294967295, %s725_s14   ;;  %s479_s16 = sadd.s32 4294967294, %s725_s14   ;;  %s725_s14 = sphi %s757_s14, %s19_s14   ;;  %s721_s13 = sphi %s755_s13, %s999_s13   ;;  %s717_s12 = sphi %s753_s12, %s998_s12   ;;  %s713_s11 = sphi %s751_s11, %s997_s11   ;;  %s709_s10 = sphi %s749_s10, %s996_s10   ;;  %s705_s9 = sphi %s747_s9, %s995_s9  }
   0x8   : > { %s61_s17 = sadd.s32 1, %s713_s11  ;;  %p68_p0 = scmp.ne.s32.totalorder %s713_s11, %s709_s10 }
   0x9   : > { %p69_p1 = scmp.eq.s32.totalorder %s725_s14, 0  ;;  %p74_p2 = scmp.ne.s32.totalorder %s709_s10, %s705_s9 }
   0xa   : > { %p785_p3 = scmp.eq.s32.totalorder %s478_s15, 0  ;;  %p100_p4 = scmp.eq.s32.totalorder %s478_s15, 1 }
   0xb   : > { %p789_p5 = por %p69_p1, %p68_p0  ;;  %p106_p6 = scmp.eq.s32.totalorder %s479_s16, 1 }
   0xc   : > { %p795_p7 = por %p785_p3, %p74_p2  ;;  %p799_p8 = por %p100_p4, %p68_p0 }
   0xd   : > { %p803_p9 = por %p106_p6, %p74_p2  ;;  %p480_p10 = scmp.ge.s32.totalorder %s725_s14, 1 }
   0xe   : > { %p113_p11 = scmp.lt.s32.totalorder %s725_s14, 3  ;;  %s125_s25 = sshll.u32 %s985_s0, 4  ;;  %s126_s25 = int_to_ptr.hbm [resolvable:$true] %s125_s25 }
   0xf   : > { %p482_p13 = scmp.ge.s32.totalorder %s725_s14, 2  ;;  %p530_p0 = scmp.lt.s32.totalorder %s725_s14, 2 }
  0x10   : > { %p812_p12 = pnand %p480_p10, %p113_p11  ;;  %s31_s28 = sadd.s32 1, %s721_s13 }
  0x11   : > { %p822_p2 = pnand %p530_p0, %p789_p5  ;;  %p33_p6 = scmp.ge.s32.totalorder %s31_s28, 2 }
  0x12   : > { %p517_p1 = pneg %p812_p12  ;;  %s136_s29 = sand.u32 1, %s713_s11  }
  0x13   : > { %s727_s30 = smov [#allocation2]   ;;  %s1001_s28 = smov (%p33_p6, %s31_s28), 0 }
  0x14   : > { %p518_p4 = pnand %p517_p1, %p785_p3  ;;  %s505_s3 = smul.u32 48, %s136_s29 }
  0x15   : > { %s56_s4 = ssub.s32 %s721_s13, %s1001_s28  ;;  %s506_s5 = smul.u32 48, %s721_s13 }
  0x16   : > { %520 = dma.hbm_to_smem (!%p518_p4), %s126_s25, 16, %s727_s30, [#allocation5]  }
  0x17   : > { %p59_p10 = scmp.eq.s32.totalorder %s56_s4, 0  ;;  %s147_s8 = scalar_lea.hbm %s986_s1, %s506_s5 }
  0x18   : > { %s140_s15 = scalar_lea.vmem [#allocation6], %s505_s3  ;;  %s148_s23 = sshll.u32 %s147_s8, 4  ;;  %s149_s23 = int_to_ptr.hbm [resolvable:$true] %s148_s23 }
  0x19   : > { %s150_s16 = sshll.u32 %s140_s15, 4  ;;  %s137_s24 = scalar_lea.sflag [#allocation3], %s136_s29  ;;  %s151_s16 = int_to_ptr.vmem [resolvable:$true] %s150_s16 }
  0x1a   : > { %s841_s19 = scalar_select %p59_p10, %s713_s11, %s61_s17  }
  0x1b   : > { %s728_s25 = smov 256   ;;  %s729_s30 = smov 16  }
  0x1c   : > { %524 = dma.hbm_to_vmem [thread:$0]  (!%p822_p2), %s149_s23, 768, %s151_s16, %s137_s24, %s728_s25, %s728_s25, %s729_s30  }
  0x1d   : > { %162 = sbr.rel (%p812_p12) target bundleno = 105 (0x69), region = 28 }
  0x22   : > { %692 = dma.done.wait (%p785_p3), [#allocation5], 16  }
  0x23   : > { %694 = vsyncadd (%p785_p3), [#allocation5], 4294967280  ;;  %s852_s17 = sand.u32 1, %s709_s10  }
  0x24   : > { %s507_s29 = smul.u32 48, %s852_s17  ;;  %s170_s3 = scalar_lea.sflag [#allocation3], %s852_s17 }
  0x26   : > { %s173_s27 = scalar_lea.vmem [#allocation6], %s507_s29 }
  0x27   : > { %696 = dma.done.wait (%p795_p7), %s170_s3, 768  }
  0x28   : > { %698 = vsyncadd (%p795_p7), %s170_s3, 4294966528 }
  0x29   : > { %179 = sfence }
  0x2a   : > { %v862_v0 = vld [vmem:[%s173_s27] sm:$0xff]  ;;  %v864_v1 = vld [vmem:[%s173_s27 + $0x10] sm:$0xff]  ;;  %v870_v5 = vld [vmem:[%s173_s27 + $0x8] sm:$0xff]  ;;  %s905_s18 = sld [smem:[#allocation2 + %s717_s12]]  ;;  %s508_s26 = smul.u32 48, %s717_s12 }
  0x2b   : > { %v488_v2 = vld [vmem:[%s173_s27 + $0x20] sm:$0xff]  ;;  %v205_v3 = vmax.f32 %v862_v0, %v864_v1  ;;  %v209_v4 = vmin.f32 %v862_v0, %v864_v1  ;;  %v872_v6 = vld [vmem:[%s173_s27 + $0x18] sm:$0xff]  ;;  %v489_v7 = vld [vmem:[%s173_s27 + $0x28] sm:$0xff]  ;;  %v259_v28 = vsub.f32 %v862_v0, %v864_v1  ;;  %s195_s6 = scalar_lea.vmem [#allocation7], %s507_s29  ;;  %s362_s15 = scalar_lea.sflag [#allocation4], %s852_s17 }
  0x2c   : > { %v206_v8 = vmax.f32 %v870_v5, %v872_v6  ;;  %v210_v9 = vmin.f32 %v870_v5, %v872_v6  ;;  %v243_v26 = vsub.f32 %v864_v1, %v488_v2  ;;  %v253_v27 = vsub.f32 %v488_v2, %v862_v0  ;;  %s375_s12 = scalar_lea.hbm %s987_s2, %s508_s26  ;;  %s376_s7 = sshll.u32 %s195_s6, 4  ;;  %s377_s7 = int_to_ptr.vmem [resolvable:$true] %s376_s7 }
  0x2d   : > { %v878_v10 = vmax.f32 %v205_v3, %v488_v2  ;;  %v211_v11 = vmin.f32 %v209_v4, %v488_v2  ;;  %v244_v31 = vsub.f32 %v872_v6, %v489_v7  ;;  %v254_v32 = vsub.f32 %v489_v7, %v870_v5  ;;  %s378_s8 = sshll.u32 %s375_s12, 4  ;;  %s659_s30 = scalar_lea.hbm %s987_s2, 96  ;;  %s379_s8 = int_to_ptr.hbm [resolvable:$true] %s378_s8 }
  0x2e   : > { %v880_v12 = vmax.f32 %v206_v8, %v489_v7  ;;  %v212_v13 = vmin.f32 %v210_v9, %v489_v7  ;;  %v260_v36 = vsub.f32 %v870_v5, %v872_v6  ;;  %s653_s16 = sshra.s32 %s379_s8, 4  ;;  %s654_s16 = int_to_ptr.hbm [resolvable:$true] %s653_s16 }
  0x2f   : > { %v883_v14 = vsub.f32 %v878_v10, %v211_v11  ;;  %vm227_vm0 = vcmp.eq.f32.partialorder %v878_v10, 0.0  ;;  %vm265_vm4 = vcmp.eq.f32.partialorder %v878_v10, %v862_v0  ;;  %vm267_vm5 = vcmp.eq.f32.partialorder %v878_v10, %v864_v1  ;;  %s655_s23 = scalar_lea.hbm %s654_s16, 48  ;;  %p660_p11 = scmp.lt.s32.totalorder %s654_s16, %s987_s2 }
  0x30   : > { %v229_v15 = vsel %vm227_vm0, 1.0, %v878_v10  ;;  %v890_v16 = vsub.f32 %v880_v12, %v212_v13  ;;  %vm228_vm3 = vcmp.eq.f32.partialorder %v880_v12, 0.0  ;;  %s275_s20 = smul.f32 6.0, %s905_s18  ;;  %vm268_vm8 = vcmp.eq.f32.partialorder %v880_v12, %v872_v6  ;;  %p656_p3 = scmp.ne.s32.totalorder %s654_s16, %s655_s23 }
  0x31   : > { %vm215_vm1 = vcmp.eq.f32.partialorder %v883_v14, 0.0  ;;  %586 = vrcp.f32 %v229_v15  ;;  %v230_v19 = vsel %vm228_vm3, 1.0, %v880_v12  ;;  %vm266_vm9 = vcmp.eq.f32.partialorder %v880_v12, %v870_v5  ;;  %p661_p12 = scmp.lt.s32.totalorder %s659_s30, %s655_s23 }
  0x32   : > { %v217_v17 = vsel %vm215_vm1, 1.0, %v883_v14  ;;  %vm216_vm2 = vcmp.eq.f32.partialorder %v890_v16, 0.0  ;;  %v276_v52 = vstv %s275_s20  ;;  %p657_p5 = pnand %p656_p3, %p799_p8 }
  0x33   : > { %588 = vrcp.f32 %v217_v17  ;;  %v218_v18 = vsel %vm216_vm2, 1.0, %v890_v16  ;;  %p662_p0 = por %p661_p12, %p660_p11 }
  0x34   : > { %590 = vrcp.f32 %v218_v18  ;;  %p658_p7 = pneg %p657_p5 }
  0x35   : > { %592 = vrcp.f32 %v230_v19 }
  0x36   : > { %p663_p1 = pnand %p662_p0, %p658_p7 }
  0x37   : > { %v587_v20 = vpop.eup %586 }
  0x38   : > { %v233_v29 = vmul.f32 %v587_v20, %v229_v15 }
  0x39   : > { %v589_v21 = vpop.eup %588 }
  0x3a   : > { %v591_v22 = vpop.eup %590  ;;  %v221_v23 = vmul.f32 %v589_v21, %v217_v17  ;;  %v235_v40 = vsub.f32 2.0, %v233_v29 }
  0x3b   : > { %v222_v24 = vmul.f32 %v591_v22, %v218_v18  ;;  %v593_v33 = vpop.eup %592 }
  0x3c   : > { %v223_v25 = vsub.f32 2.0, %v221_v23  ;;  %v234_v41 = vmul.f32 %v593_v33, %v230_v19  ;;  %v237_v57 = vmul.f32 %v587_v20, %v235_v40 }
  0x3d   : > { %v224_v30 = vsub.f32 2.0, %v222_v24 }
  0x3e   : > { %v225_v34 = vmul.f32 %v589_v21, %v223_v25  ;;  %v236_v59 = vsub.f32 2.0, %v234_v41  ;;  %v239_v1 = vmul.f32 %v237_v57, %v883_v14 }
  0x3f   : > { %v226_v35 = vmul.f32 %v591_v22, %v224_v30 }
  0x40   : > { %v245_v37 = vmul.f32 %v243_v26, %v225_v34  ;;  %v255_v38 = vmul.f32 %v253_v27, %v225_v34  ;;  %v261_v39 = vmul.f32 %v259_v28, %v225_v34  ;;  %v238_v3 = vmul.f32 %v593_v33, %v236_v59 }
  0x41   : > { %v246_v42 = vmul.f32 %v244_v31, %v226_v35  ;;  %v256_v43 = vmul.f32 %v254_v32, %v226_v35  ;;  %v262_v49 = vmul.f32 %v260_v36, %v226_v35  ;;  %v241_v13 = vsel %vm227_vm0, 0.0, %v239_v1 }
  0x42   : > { %vm247_vm6 = vcmp.lt.f32.partialorder %v245_v37, 0.0  ;;  %v249_v44 = vadd.f32 6.0, %v245_v37  ;;  %v257_v45 = vadd.f32 2.0, %v255_v38  ;;  %v263_v46 = vadd.f32 4.0, %v261_v39 }
  0x43   : > { %vm248_vm7 = vcmp.lt.f32.partialorder %v246_v42, 0.0  ;;  %v250_v47 = vadd.f32 6.0, %v246_v42  ;;  %v258_v48 = vadd.f32 2.0, %v256_v43  ;;  %v264_v55 = vadd.f32 4.0, %v262_v49 }
  0x44   : > { %v251_v50 = vsel %vm247_vm6, %v249_v44, %v245_v37  ;;  %v269_v51 = vsel %vm267_vm5, %v257_v45, %v263_v46  ;;  %v240_v15 = vmul.f32 %v238_v3, %v890_v16  ;;  %v291_v22 = vmul.f32 %v241_v13, %v878_v10 }
  0x45   : > { %v271_v53 = vsel %vm265_vm4, %v251_v50, %v269_v51  ;;  %v252_v54 = vsel %vm248_vm7, %v250_v47, %v246_v42  ;;  %v270_v60 = vsel %vm268_vm8, %v258_v48, %v264_v55 }
  0x46   : > { %v273_v56 = vsel %vm215_vm1, 0.0, %v271_v53  ;;  %v272_v61 = vsel %vm266_vm9, %v252_v54, %v270_v60  ;;  %v242_v39 = vsel %vm228_vm3, 0.0, %v240_v15 }
  0x47   : > { %v277_v58 = vadd.f32 %v276_v52, %v273_v56  ;;  %v274_v63 = vsel %vm216_vm2, 0.0, %v272_v61  ;;  %v292_v49 = vmul.f32 %v242_v39, %v880_v12 }
  0x48   : > { %v278_v0 = vadd.f32 %v276_v52, %v274_v63 }
  0x49   : > { %vm279_vm10 = vcmp.lt.f32.partialorder %v277_v58, 0.0  ;;  %v281_v62 = vadd.f32 6.0, %v277_v58 }
  0x4a   : > { %vm280_vm12 = vcmp.lt.f32.partialorder %v278_v0, 0.0  ;;  %v282_v5 = vadd.f32 6.0, %v278_v0 }
  0x4b   : > { %v283_v2 = vsel %vm279_vm10, %v281_v62, %v277_v58 }
  0x4c   : > { %vm285_vm11 = vcmp.ge.f32.partialorder %v283_v2, 6.0  ;;  %v490_v4 = vadd.f32 -6.0, %v283_v2  ;;  %v284_v7 = vsel %vm280_vm12, %v282_v5, %v278_v0 }
  0x4d   : > { %vm286_vm13 = vcmp.ge.f32.partialorder %v284_v7, 6.0  ;;  %v491_v9 = vadd.f32 -6.0, %v284_v7 }
  0x4e   : > { %v289_v6 = vsel %vm285_vm11, %v490_v4, %v283_v2 }
  0x4f   : > { %v293_v8 = vadd.f32 5.0, %v289_v6  ;;  %v313_v11 = vadd.f32 3.0, %v289_v6  ;;  %v333_v17 = vadd.f32 1.0, %v289_v6  ;;  %v290_v18 = vsel %vm286_vm13, %v491_v9, %v284_v7 }
  0x50   : > { %v294_v19 = vadd.f32 5.0, %v290_v18  ;;  %v314_v21 = vadd.f32 3.0, %v290_v18  ;;  %v334_v25 = vadd.f32 1.0, %v290_v18 }
  0x51   : > { %vm295_vm14 = vcmp.ge.f32.partialorder %v293_v8, 6.0  ;;  %v492_v14 = vadd.f32 -6.0, %v293_v8  ;;  %vm315_vm15 = vcmp.ge.f32.partialorder %v313_v11, 6.0  ;;  %v494_v20 = vadd.f32 -6.0, %v313_v11 }
  0x52   : > { %vm335_vm1 = vcmp.ge.f32.partialorder %v333_v17, 6.0  ;;  %v496_v24 = vadd.f32 -6.0, %v333_v17  ;;  %vm296_vm2 = vcmp.ge.f32.partialorder %v294_v19, 6.0  ;;  %v493_v27 = vadd.f32 -6.0, %v294_v19 }
  0x53   : > { %v299_v23 = vsel %vm295_vm14, %v492_v14, %v293_v8  ;;  %v319_v28 = vsel %vm315_vm15, %v494_v20, %v313_v11  ;;  %vm316_vm0 = vcmp.ge.f32.partialorder %v314_v21, 6.0  ;;  %v495_v16 = vadd.f32 -6.0, %v314_v21 }
  0x54   : > { %v301_v26 = vsub.f32 4.0, %v299_v23  ;;  %v321_v29 = vsub.f32 4.0, %v319_v28  ;;  %v339_v30 = vsel %vm335_vm1, %v496_v24, %v333_v17  ;;  %v300_v32 = vsel %vm296_vm2, %v493_v27, %v294_v19 }
  0x55   : > { %v341_v33 = vsub.f32 4.0, %v339_v30  ;;  %vm336_vm4 = vcmp.ge.f32.partialorder %v334_v25, 6.0  ;;  %v302_v34 = vsub.f32 4.0, %v300_v32  ;;  %v320_v36 = vsel %vm316_vm0, %v495_v16, %v314_v21 }
  0x56   : > { %v303_v31 = vmin.f32 %v299_v23, %v301_v26  ;;  %v323_v35 = vmin.f32 %v319_v28, %v321_v29  ;;  %v497_v37 = vadd.f32 -6.0, %v334_v25  ;;  %v322_v40 = vsub.f32 4.0, %v320_v36 }
  0x57   : > { %v343_v41 = vmin.f32 %v339_v30, %v341_v33  ;;  %v304_v42 = vmin.f32 %v300_v32, %v302_v34 }
  0x58   : > { %v305_v38 = vmin.f32 %v303_v31, 1.0  ;;  %v325_v43 = vmin.f32 %v323_v35, 1.0  ;;  %v340_v44 = vsel %vm336_vm4, %v497_v37, %v334_v25  ;;  %v324_v46 = vmin.f32 %v320_v36, %v322_v40 }
  0x59   : > { %v345_v47 = vmin.f32 %v343_v41, 1.0  ;;  %v342_v48 = vsub.f32 4.0, %v340_v44  ;;  %v306_v50 = vmin.f32 %v304_v42, 1.0 }
  0x5a   : > { %v307_v45 = vmax.f32 %v305_v38, 0.0  ;;  %v327_v51 = vmax.f32 %v325_v43, 0.0  ;;  %v326_v53 = vmin.f32 %v324_v46, 1.0 }
  0x5b   : > { %v347_v54 = vmax.f32 %v345_v47, 0.0  ;;  %v344_v55 = vmin.f32 %v340_v44, %v342_v48  ;;  %v308_v56 = vmax.f32 %v306_v50, 0.0 }
  0x5c   : > { %v309_v52 = vmul.f32 %v307_v45, %v291_v22  ;;  %v329_v57 = vmul.f32 %v327_v51, %v291_v22  ;;  %v328_v59 = vmax.f32 %v326_v53, 0.0 }
  0x5d   : > { %v349_v60 = vmul.f32 %v347_v54, %v291_v22  ;;  %v346_v61 = vmin.f32 %v344_v55, 1.0  ;;  %v310_v62 = vmul.f32 %v308_v56, %v292_v49 }
  0x5e   : > { %v311_v58 = vsub.f32 %v878_v10, %v309_v52  ;;  %v331_v63 = vsub.f32 %v878_v10, %v329_v57  ;;  %v330_v0 = vmul.f32 %v328_v59, %v292_v49 }
  0x5f   : > { %v351_v1 = vsub.f32 %v878_v10, %v349_v60  ;;  %v348_v2 = vmax.f32 %v346_v61, 0.0  ;;  %v312_v3 = vsub.f32 %v880_v12, %v310_v62 }
  0x60   : > { %353 = vst [vmem:[%s195_s6] sm:$0xff] %v311_v58  ;;  %v332_v4 = vsub.f32 %v880_v12, %v330_v0 }
  0x61   : > { %498 = vst [vmem:[%s195_s6 + $0x10] sm:$0xff] %v331_v63  ;;  %v350_v5 = vmul.f32 %v348_v2, %v292_v49 }
  0x62   : > { %500 = vst [vmem:[%s195_s6 + $0x20] sm:$0xff] %v351_v1 }
  0x63   : > { %354 = vst [vmem:[%s195_s6 + $0x8] sm:$0xff] %v312_v3  ;;  %v352_v6 = vsub.f32 %v880_v12, %v350_v5 }
  0x64   : > { %499 = vst [vmem:[%s195_s6 + $0x18] sm:$0xff] %v332_v4 }
  0x65   : > { %501 = vst [vmem:[%s195_s6 + $0x28] sm:$0xff] %v352_v6 }
  0x66   : > { %666 = shalt.err (!%p663_p1)
}
  0x67   : > { %s730_s17 = smov 256   ;;  %s731_s27 = smov 16  }
  0x68   : > { %515 = dma.vmem_to_hbm [thread:$0]  (%p799_p8), %s377_s7, 768, %s379_s8, %s362_s15, %s730_s17, %s730_s17, %s731_s27  }
  0x69 PF: > { %s393_s18 = sand.u32 1, %s705_s9   ;;  %p526_p2 = pnand %p482_p13, %p803_p9 }
  0x6a   : > { %s394_s20 = scalar_lea.sflag [#allocation4], %s393_s18 }
  0x6b   : > { %p527_p4 = pneg %p526_p2 }
  0x6d   : > { %700 = dma.done.wait (%p527_p4), %s394_s20, 768  }
  0x6e   : > { %702 = vsyncadd (%p527_p4), %s394_s20, 4294966528  ;;  %s19_s14 = sadd.s32 1, %s725_s14   ;;  %s995_s9 = smov %s709_s10 }
  0x6f   : > { %p16_p6 = scmp.ge.s32.totalorder %s19_s14, 4   ;;  %s996_s10 = smov %s713_s11 }
  0x70   : > { %s997_s11 = smov %s841_s19  ;;  %s998_s12 = smov %s721_s13 }
  0x71   : > { %s999_s13 = smov %s1001_s28  ;;  %18 = sbr.rel (!%p16_p6) target bundleno = 7 (0x7), region = 82 }
  0x76   :  { %400 = vsyncpa [#allocation3], 1 }
  0x77   :  { %402 = vsyncpa [#allocation3 + $0x1], 1 }
  0x78   :  { %403 = vsyncpa [#allocation4], 1 }
  0x79   :  { %405 = vsyncpa [#allocation4 + $0x1], 1 }
  0x7a   :  { %406 = vsyncpa [#allocation5], 1 }
  0x7b   :  { %408 = vsyncpa [#allocation5 + $0x1], 1 }

</bundles_post_ra>
